<compile_context>
chip_gen: v5e
topology: v5e:2x2
jax: 0.10.0
libtpu: 0.0.40
codegen_flags: <defaults>
</compile_context>

<pallas_src>
import functools

import jax
import jax.numpy as jnp
from jax.experimental import pallas as pl
from jax.experimental.pallas import tpu as pltpu


def _spatial_reduce_kernel(x_ref, out_ref, sum_acc, max_acc, *,
                           hw_total, tile_hw, nh_total, nh_per_split,
                           nsplit, acc_w):
    """Tiled mean/max over the flattened spatial (lane) dim.

    x_ref:   (TILE_R, TILE_HW) block of the (B*C, HW) input
    out_ref: (TILE_R, 2) per-split partial [mean_partial, max_partial]
    sum_acc/max_acc: (TILE_R, ACC_W) f32 lane-wise VMEM accumulators
    """
    inv_hw = 1.0 / float(hw_total)

    def write_out(row_sum, row_max):
        # Single lane-wise select + one store instead of two width-1 stores.
        col = jax.lax.broadcasted_iota(jnp.int32, out_ref.shape, 1)
        out_ref[...] = jnp.where(col == 0, row_sum * inv_hw,
                                 row_max).astype(out_ref.dtype)

    if nh_total == 1:
        # Single HW tile: no steady state, just reduce and write.
        x = x_ref[...].astype(jnp.float32)
        write_out(jnp.sum(x, axis=-1, keepdims=True),
                  jnp.max(x, axis=-1, keepdims=True))
        return

    s = pl.program_id(0)           # megacore split index
    h = pl.program_id(2)           # HW step within this split
    h_global = s * nh_per_split + h

    @pl.when(h == 0)
    def _():
        sum_acc[...] = jnp.zeros_like(sum_acc)
        max_acc[...] = jnp.full_like(max_acc, -jnp.inf)

    x = x_ref[...].astype(jnp.float32)
    n_chunks = tile_hw // acc_w

    def accumulate(x_sum, x_max):
        # Lane-aligned chunk adds/maxes: pure VPU work in the inner loop; the
        # cross-lane (XLU) reduce is deferred to the finalize step.
        s_part = x_sum[:, 0:acc_w]
        m_part = x_max[:, 0:acc_w]
        for k in range(1, n_chunks):
            lo = k * acc_w
            s_part = s_part + x_sum[:, lo:lo + acc_w]
            m_part = jnp.maximum(m_part, x_max[:, lo:lo + acc_w])
        sum_acc[...] = sum_acc[...] + s_part
        max_acc[...] = jnp.maximum(max_acc[...], m_part)

    has_remainder = (hw_total % tile_hw) != 0          # static
    padded_split = nsplit * nh_per_split > nh_total    # static

    if has_remainder:
        # Mask only on the last *global* HW tile; all other tiles stay unmasked.
        @pl.when(h_global < nh_total - 1)
        def _():
            accumulate(x, x)

        @pl.when(h_global == nh_total - 1)
        def _():
            rem = hw_total - (nh_total - 1) * tile_hw
            lane = jax.lax.broadcasted_iota(jnp.int32, x.shape, 1)
            valid = lane < rem
            accumulate(jnp.where(valid, x, 0.0),
                       jnp.where(valid, x, -jnp.inf))
    elif padded_split:
        # Odd tile count split across 2 cores: skip the duplicated padding tile.
        @pl.when(h_global < nh_total)
        def _():
            accumulate(x, x)
    else:
        accumulate(x, x)

    @pl.when(h == nh_per_split - 1)
    def _():
        write_out(jnp.sum(sum_acc[...], axis=-1, keepdims=True),
                  jnp.max(max_acc[...], axis=-1, keepdims=True))


def _vmem_capacity_bytes():
    try:
        return int(pltpu.get_tpu_info().vmem_capacity_bytes)
    except Exception:
        return 64 * 1024 * 1024   # conservative (v7x-sized); safe everywhere


def _mlp(t, w1, b1, w2, b2):
    h = jnp.maximum(t @ w1.T + b1, 0.0)
    return h @ w2.T + b2


def spectral_attention_gate(x_nchw, w1, b1, w2, b2, *, max_tile_hw=None):
    """Returns the (B, C, 1, 1) gate (the consumer broadcasts / fuses it).

    max_tile_hw (optional, multiple of 512): cap the HW tile size — used only
    to exercise the multi-tile / split / remainder code paths in tests.
    """
    B, C, H, W = x_nchw.shape
    R = B * C
    HW = H * W
    x2d = x_nchw.reshape(R, HW)   # rows on sublanes, spatial on lanes

    itemsize = x2d.dtype.itemsize
    vmem_cap = _vmem_capacity_bytes()
    big_vmem = vmem_cap >= 96 * 1024 * 1024          # v5e/v6e (128 MiB) vs v7x (64 MiB)
    target_block_bytes = (16 if big_vmem else 8) * 1024 * 1024
    vmem_limit = (64 if big_vmem else 40) * 1024 * 1024

    # Row tile: full extent (exempt from the 8-multiple rule) when small.
    TILE_R = R if R <= 256 else 256

    # Spatial tile: ~8/16 MiB blocks (double-buffered by BlockSpec), multiple of
    # 512 lanes, or the full HW extent when it already fits in one block.
    if max_tile_hw is not None:
        max_hw = int(max_tile_hw)
    else:
        max_hw = max(512, (target_block_bytes // (TILE_R * itemsize)) // 512 * 512)
    TILE_HW = HW if HW <= max_hw else max_hw

    nh_total = pl.cdiv(HW, TILE_HW)
    # Megacore: split the HW reduction across a leading parallel axis so both
    # TensorCores (v7x) stream half of x; partials are combined below.
    NSPLIT = 2 if nh_total >= 2 else 1
    nh_per_split = pl.cdiv(nh_total, NSPLIT)
    n_r_tiles = pl.cdiv(R, TILE_R)

    if nh_total == 1:
        ACC_W = 128                       # scratch unused in the single-tile path
    elif TILE_HW % 512 == 0:
        ACC_W = 512
    else:
        ACC_W = TILE_HW                   # single-chunk fallback

    if NSPLIT * nh_per_split > nh_total:
        # Odd tile count: clamp the block index so the padding step never DMAs
        # out of range (its contribution is skipped inside the kernel).
        def x_index(s, r, h):
            return (r, jnp.minimum(s * nh_per_split + h, nh_total - 1))
    else:
        def x_index(s, r, h):
            return (r, s * nh_per_split + h)

    kernel = functools.partial(
        _spatial_reduce_kernel,
        hw_total=HW, tile_hw=TILE_HW, nh_total=nh_total,
        nh_per_split=nh_per_split, nsplit=NSPLIT, acc_w=ACC_W)

    partials = pl.pallas_call(
        kernel,
        out_shape=jax.ShapeDtypeStruct((NSPLIT, R, 2), jnp.float32),
        grid=(NSPLIT, n_r_tiles, nh_per_split),
        in_specs=[pl.BlockSpec((TILE_R, TILE_HW), x_index)],
        out_specs=pl.BlockSpec((None, TILE_R, 2), lambda s, r, h: (s, r, 0)),
        scratch_shapes=[pltpu.VMEM((TILE_R, ACC_W), jnp.float32),
                        pltpu.VMEM((TILE_R, ACC_W), jnp.float32)],
        compiler_params=pltpu.CompilerParams(
            dimension_semantics=("parallel", "parallel", "arbitrary"),
            vmem_limit_bytes=vmem_limit),
    )(x2d)

    # Combine the per-split partials (sum already divided by HW in-kernel).
    mean_bc = jnp.sum(partials[:, :, 0], axis=0).reshape(B, C)
    max_bc = jnp.max(partials[:, :, 1], axis=0).reshape(B, C)

    # Tiny gate MLP (C -> 8 -> C) + sigmoid in plain jnp: XLA fuses it for free.
    # `mean_bc[0]` (batch-0 mean) is faithful to the quirky `self.mlp(avgt[0])`
    # in the PyTorch reference — intentional, do not "fix".
    weighted_avgt = _mlp(mean_bc[0], w1, b1, w2, b2)   # (C,)
    weighted_maxt = _mlp(max_bc, w1, b1, w2, b2)       # (B, C)
    gate = jax.nn.sigmoid(weighted_maxt + weighted_avgt)
    return gate[:, :, None, None].astype(jnp.float32)


def spectral_attention(x_nchw, w1, b1, w2, b2):
    """Full module semantics: gate broadcast to x's shape (expand_as)."""
    gate = spectral_attention_gate(x_nchw, w1, b1, w2, b2)
    # Broadcast is done by XLA outside the kernel (fuses into downstream mults).
    return jnp.broadcast_to(gate, x_nchw.shape)


def _reference(x_nchw, w1, b1, w2, b2):
    """Pure-JAX reference mirroring the PyTorch forward exactly."""
    B, C, H, W = x_nchw.shape
    xf = x_nchw.reshape(B, C, -1).astype(jnp.float32)
    avgt = jnp.mean(xf, axis=2)          # (B, C)
    maxt = jnp.max(xf, axis=2)           # (B, C)  (values, like maxt[0] in torch)

    weighted_avgt = _mlp(avgt[0], w1, b1, w2, b2)   # (C,)  -- avgt[0] = batch 0
    weighted_maxt = _mlp(maxt, w1, b1, w2, b2)      # (B, C)
    gate = jax.nn.sigmoid(weighted_maxt + weighted_avgt)
    return jnp.broadcast_to(gate[:, :, None, None], x_nchw.shape)


if __name__ == "__main__":
    key = jax.random.PRNGKey(0)
    B, C, H, W = 2, 4, 16, 16
    feature_channel = C

    k_x, k_w1, k_b1, k_w2, k_b2 = jax.random.split(key, 5)
    x = jax.random.normal(k_x, (B, C, H, W), dtype=jnp.float32)

    # Deterministic MLP params: Linear(C, 8) then Linear(8, C)
    w1 = 0.1 * jax.random.normal(k_w1, (8, feature_channel), jnp.float32)
    b1 = 0.1 * jax.random.normal(k_b1, (8,), jnp.float32)
    w2 = 0.1 * jax.random.normal(k_w2, (feature_channel, 8), jnp.float32)
    b2 = 0.1 * jax.random.normal(k_b2, (feature_channel,), jnp.float32)

    out = jax.block_until_ready(spectral_attention(x, w1, b1, w2, b2))
    ref = _reference(x, w1, b1, w2, b2)
    assert out.shape == (B, C, H, W)
    assert jnp.allclose(out, ref, atol=1e-5, rtol=1e-5), "mismatch vs reference"

    # Exercise the multi-tile / megacore-split / remainder-mask code paths at
    # small sizes by capping the HW tile to 512 lanes.
    for (hh, ww) in ((40, 40), (33, 33)):   # even and odd (padded-split) tile counts
        x2 = jax.random.normal(jax.random.PRNGKey(1), (B, C, hh, ww), jnp.float32)
        gate2 = jax.block_until_ready(
            spectral_attention_gate(x2, w1, b1, w2, b2, max_tile_hw=512))
        ref2 = _reference(x2, w1, b1, w2, b2)
        assert jnp.allclose(jnp.broadcast_to(gate2, x2.shape), ref2,
                            atol=1e-5, rtol=1e-5), f"mismatch at {(hh, ww)}"

    print("KERNEL_OK")
</pallas_src>

<mosaic_0001>
module attributes {stable_mosaic.version = 11 : i64} {
  func.func @_spatial_reduce_kernel(%arg0: i32, %arg1: i32, %arg2: i32, %arg3: memref<8x256xf32, #tpu.memory_space<vmem>>, %arg4: memref<1x8x2xf32, #tpu.memory_space<vmem>>, %arg5: memref<8x128xf32, #tpu.memory_space<vmem>>, %arg6: memref<8x128xf32, #tpu.memory_space<vmem>>) attributes {dimension_semantics = [#tpu.dimension_semantics<parallel>, #tpu.dimension_semantics<parallel>, #tpu.dimension_semantics<arbitrary>], iteration_bounds = array<i64: 1, 1, 1>, scalar_prefetch = 0 : i64, scratch_operands = 2 : i64, tpu.core_type = #tpu.core_type<tc>, window_params = [{transform_indices = @transform_0, window_bounds = array<i64: 8, 256>}, {transform_indices = @transform_1, window_bounds = array<i64: 1, 8, 2>}]} {
    %c0 = arith.constant 0 : index
    %c0_0 = arith.constant 0 : index
    %0 = vector.load %arg3[%c0, %c0_0] : memref<8x256xf32, #tpu.memory_space<vmem>>, vector<8x256xf32>
    %cst = arith.constant dense<0.000000e+00> : vector<8xf32>
    %1 = vector.multi_reduction <add>, %0, %cst [1] : vector<8x256xf32> to vector<8xf32>
    %2 = vector.shape_cast %1 : vector<8xf32> to vector<8x1xf32>
    %cst_1 = arith.constant dense<0xFF800000> : vector<8xf32>
    %3 = vector.multi_reduction <maximumf>, %0, %cst_1 [1] : vector<8x256xf32> to vector<8xf32>
    %4 = vector.shape_cast %3 : vector<8xf32> to vector<8x1xf32>
    %5 = tpu.iota {dimensions = array<i32: 1>} : vector<8x2xi32>
    %c0_i32 = arith.constant 0 : i32
    %6 = vector.broadcast %c0_i32 : i32 to vector<8x2xi32>
    %7 = arith.cmpi eq, %5, %6 : vector<8x2xi32>
    %cst_2 = arith.constant 3.906250e-03 : f32
    %8 = vector.broadcast %cst_2 : f32 to vector<8x1xf32>
    %9 = arith.mulf %2, %8 : vector<8x1xf32>
    %10 = vector.shape_cast %9 : vector<8x1xf32> to vector<8x1xf32>
    %11 = vector.broadcast %10 : vector<8x1xf32> to vector<8x2xf32>
    %12 = vector.shape_cast %4 : vector<8x1xf32> to vector<8x1xf32>
    %13 = vector.broadcast %12 : vector<8x1xf32> to vector<8x2xf32>
    %14 = arith.select %7, %11, %13 : vector<8x2xi1>, vector<8x2xf32>
    %c0_3 = arith.constant 0 : index
    %c0_4 = arith.constant 0 : index
    %c0_5 = arith.constant 0 : index
    %15 = vector.load %arg4[%c0_3, %c0_4, %c0_5] : memref<1x8x2xf32, #tpu.memory_space<vmem>>, vector<1x8x2xf32>
    %16 = vector.shape_cast %15 : vector<1x8x2xf32> to vector<8x2xf32>
    %17 = vector.shape_cast %14 : vector<8x2xf32> to vector<1x8x2xf32>
    tpu.vector_store %arg4[%c0_3, %c0_4, %c0_5], %17 {strides = array<i32>} : memref<1x8x2xf32, #tpu.memory_space<vmem>>, vector<1x8x2xf32>,
    return
  }
  func.func @transform_0(%arg0: i32, %arg1: i32, %arg2: i32) -> (i32, i32) {
    %c1_i32 = arith.constant 1 : i32
    %0 = arith.muli %arg0, %c1_i32 : i32
    %1 = arith.addi %0, %arg2 : i32
    %c0_i32 = arith.constant 0 : i32
    return %arg1, %1 : i32, i32
  }
  func.func @transform_1(%arg0: i32, %arg1: i32, %arg2: i32) -> (i32, i32, i32) {
    %c0_i32 = arith.constant 0 : i32
    %c0_i32_0 = arith.constant 0 : i32
    return %arg0, %arg1, %c0_i32 : i32, i32, i32
  }
}

</mosaic_0001>

<bundles_post_ra>
// kernel: tpu_custom_call.1
= control target key start
LH: loop header
LB: loop body
LE: loop exit
PB: predicated region body
PF: predicated region fallthrough
CT: control target
= control target key end

     0   :  { %6 = vsyncpa [#allocation5], 0  ;;  %s75_s9 = smov [#allocation4]   ;;  %s92_s0 = inlined_call_operand.hbm [shape: f32[8,256], index: 0, kind: input, shape index: {}]   ;;  %s93_s1 = inlined_call_operand.vmem [shape: f32[1,8,2], index: 1, kind: output, shape index: {}]  }
   0x1   :  { %s16_s8 = sshll.u32 %s92_s0, 4  ;;  %s18_s10 = sshll.u32 %s75_s9, 4  ;;  %s17_s8 = int_to_ptr.hbm [resolvable:$true] %s16_s8  ;;  %s19_s10 = int_to_ptr.vmem [resolvable:$true] %s18_s10 }
   0x2   :  { %21 = dma.hbm_to_vmem [thread:$0]  %s17_s8, 256, %s19_s10, [#allocation5]  }
   0x3   :  { %73 = dma.done.wait [#allocation5], 256  }
   0x4   :  { %74 = vsyncadd [#allocation5], 4294967040  ;;  %v28_v0 = vld [vmem:[#allocation4] sm:$0xff]  ;;  %v29_v1 = vld [vmem:[#allocation4 + $0x8] sm:$0xff]  ;;  %v36_v4 = vlaneseq  ;;  %vm41_vm1 = vcmask 15360  }
   0x5   :  { %v30_v2 = vadd.f32 %v29_v1, %v28_v0  ;;  %v33_v3 = vmax.f32 %v28_v0, %v29_v1 }
   0x6   :  { %v37_v6 = vand.u32 127, %v36_v4 }
   0x7   :  { %31 = vadd.xlane.f32.xlu0 %v30_v2 }
   0x8   :  { %vm38_vm0 = vcmp.eq.s32.totalorder %v37_v6, 0 }
   0xf   :  { %34 = vmax.xlane.f32.xlu0 %v33_v3 }
  0x7a   :  { %v32_v5 = vpop.xlane.xlu0 %31 }
  0x7b   :  { %v39_v7 = vmul.f32 0.00390625, %v32_v5 }
  0x82   :  { %v35_v8 = vpop.xlane.xlu0 %34 }
  0x83   :  { %v40_v9 = vsel %vm38_vm0, %v39_v7, %v35_v8 }
  0x84   :  { %42 = vst.msk [vmem:[%s93_s1] sm:$0xff] %vm41_vm1, %v40_v9 }
  0x85   :  { %47 = vsyncpa [#allocation5], 1 }

</bundles_post_ra>
